<compile_context>
chip_gen: v7x
topology: tpu7x:2x2x1
jax: 0.10.0
libtpu: 0.0.40
codegen_flags: <defaults>
</compile_context>

<pallas_src>
import functools

import jax
import jax.numpy as jnp
from jax.experimental import pallas as pl
from jax.experimental.pallas import tpu as pltpu


_VMEM_LIMIT_BYTES = 48 * 1024 * 1024   # <= physical VMEM on v5e/v6e/v7x
_FUSED_SLAB_BYTES = 4 * 1024 * 1024    # f32 bytes of one (C, HW) slab


def _sigmoid(v):
    return 1.0 / (1.0 + jnp.exp(-v))


# ---------------------------------------------------------------------------
# Fused whole-slab kernel: one batch sample per grid step.
#   x_ref   : (1, C, HW)  input slab (native dtype)
#   w1t_ref : (C, Cr)     cSE conv1 weight (transposed)
#   b1_ref  : (1, Cr)     cSE conv1 bias
#   w2_ref  : (C, Cr)     cSE conv2 weight
#   b2_ref  : (C, 1)      cSE conv2 bias
#   ws_ref  : (C, 1)      sSE conv weight (column)
#   bs_ref  : (1,)        sSE conv bias (SMEM scalar)
#   o_ref   : (1, C, HW)  output slab
# ---------------------------------------------------------------------------
def _scse_fused_kernel(x_ref, w1t_ref, b1_ref, w2_ref, b2_ref, ws_ref, bs_ref,
                       o_ref):
    x = x_ref[0]                                       # (C, HW), native dtype
    xf = x.astype(jnp.float32)
    inv_hw = 1.0 / x.shape[-1]

    # ---- cSE: global average pool + tiny channel MLP (f32 accumulation) ----
    pooled = jnp.sum(xf, axis=-1, keepdims=True) * inv_hw                 # (C,1)
    z1 = jnp.sum(pooled * w1t_ref[...], axis=0, keepdims=True) + b1_ref[...]
    z1 = jnp.maximum(z1, 0.0)                                             # (1,Cr)
    z2 = jnp.sum(w2_ref[...] * z1, axis=-1, keepdims=True) + b2_ref[...]  # (C,1)
    cse = _sigmoid(z2)                                                    # (C,1)

    # ---- sSE: 1x1 conv over channels + sigmoid (f32 accumulation) ----
    s = jnp.sum(xf * ws_ref[...], axis=0, keepdims=True) + bs_ref[0]      # (1,HW)
    sse = _sigmoid(s)

    # ---- x * cse + x * sse == x * (cse + sse); rescale in input dtype ----
    gate = (cse + sse).astype(x.dtype)                                    # (C,HW)
    o_ref[0] = (x * gate).astype(o_ref.dtype)


# ---------------------------------------------------------------------------
# Tiled pass 1: per-channel spatial-sum accumulation + cSE MLP on last tile.
# ---------------------------------------------------------------------------
def _cse_pool_kernel(x_ref, w1t_ref, b1_ref, w2_ref, b2_ref, cse_ref, acc_ref,
                     *, inv_hw):
    t = pl.program_id(1)

    @pl.when(t == 0)
    def _():
        acc_ref[...] = jnp.zeros_like(acc_ref)

    acc_ref[...] += jnp.sum(x_ref[0].astype(jnp.float32), axis=-1,
                            keepdims=True)                                # (C,1)

    @pl.when(t == pl.num_programs(1) - 1)
    def _():
        pooled = acc_ref[...] * inv_hw                                    # (C,1)
        z1 = jnp.sum(pooled * w1t_ref[...], axis=0, keepdims=True) + b1_ref[...]
        z1 = jnp.maximum(z1, 0.0)
        z2 = jnp.sum(w2_ref[...] * z1, axis=-1, keepdims=True) + b2_ref[...]
        cse_ref[0] = _sigmoid(z2)                                         # (C,1)


# ---------------------------------------------------------------------------
# Tiled pass 2: sSE + rescale per lane-dense (C, T) tile.
# ---------------------------------------------------------------------------
def _sse_rescale_kernel(x_ref, cse_ref, ws_ref, bs_ref, o_ref):
    x = x_ref[0]                                                          # (C,T)
    s = jnp.sum(x.astype(jnp.float32) * ws_ref[...], axis=0,
                keepdims=True) + bs_ref[0]                                # (1,T)
    sse = _sigmoid(s)
    gate = (cse_ref[0] + sse).astype(x.dtype)                             # (C,T)
    o_ref[0] = (x * gate).astype(o_ref.dtype)


def _choose_tile(HW, C):
    """Largest divisor of HW, multiple of 128 if possible, ~2 MiB f32 tile."""
    budget = 2 * 1024 * 1024
    max_t = (budget // (4 * C)) // 128 * 128
    max_t = max(128, min(8192, max_t))
    max_t = min(max_t, HW)
    for t in range(max_t, 127, -1):
        if HW % t == 0 and t % 128 == 0:
            return t
    # TODO(synk): no 128-multiple divisor -> masked partial stores (correct,
    # slightly slower); fall back to the largest divisor that fits.
    for t in range(min(max_t, HW), 0, -1):
        if HW % t == 0:
            return t
    return HW


# ---------------------------------------------------------------------------
# Wrapper
# ---------------------------------------------------------------------------
def scse_forward_pallas(x, params, *, force_tiled=False, tile=None):
    """Fused SCSE forward. x: (N, C, H, W), params in PyTorch-like layouts."""
    N, C, H, W = x.shape
    HW = H * W
    x3 = x.reshape(N, C, HW)           # contiguous reshape, no copy
    dtype = x.dtype

    w1 = params["w1"].astype(jnp.float32)            # (Cr, C)
    Cr = w1.shape[0]
    w1t = jnp.transpose(w1)                          # (C, Cr)
    b1r = params["b1"].astype(jnp.float32).reshape(1, Cr)
    w2 = params["w2"].astype(jnp.float32)            # (C, Cr)
    b2c = params["b2"].astype(jnp.float32).reshape(C, 1)
    wsc = params["ws"].astype(jnp.float32).reshape(C, 1)
    bs = params["bs"].astype(jnp.float32).reshape(1)

    smem_spec = pl.BlockSpec(memory_space=pltpu.MemorySpace.SMEM)

    use_fused = (not force_tiled) and (C * HW * 4 <= _FUSED_SLAB_BYTES)

    if use_fused:
        out = pl.pallas_call(
            _scse_fused_kernel,
            out_shape=jax.ShapeDtypeStruct((N, C, HW), dtype),
            grid=(N,),
            in_specs=[
                pl.BlockSpec((1, C, HW), lambda n: (n, 0, 0)),   # x (one sample)
                pl.BlockSpec((C, Cr), lambda n: (0, 0)),         # w1t (resident)
                pl.BlockSpec((1, Cr), lambda n: (0, 0)),         # b1
                pl.BlockSpec((C, Cr), lambda n: (0, 0)),         # w2
                pl.BlockSpec((C, 1), lambda n: (0, 0)),          # b2
                pl.BlockSpec((C, 1), lambda n: (0, 0)),          # ws
                smem_spec,                                       # bs (SMEM scalar)
            ],
            out_specs=pl.BlockSpec((1, C, HW), lambda n: (n, 0, 0)),
            compiler_params=pltpu.CompilerParams(
                dimension_semantics=("parallel",),
                vmem_limit_bytes=_VMEM_LIMIT_BYTES),
        )(x3, w1t, b1r, w2, b2c, wsc, bs)
        return out.reshape(N, C, H, W)

    # ---------------- tiled two-pass fallback (large C*HW) ----------------
    T = tile if tile is not None else _choose_tile(HW, C)
    assert HW % T == 0, "tile must divide H*W"
    nt = HW // T

    cse = pl.pallas_call(
        functools.partial(_cse_pool_kernel, inv_hw=1.0 / HW),
        out_shape=jax.ShapeDtypeStruct((N, C, 1), jnp.float32),
        grid=(N, nt),
        in_specs=[
            pl.BlockSpec((1, C, T), lambda n, t: (n, 0, t)),     # x tile
            pl.BlockSpec((C, Cr), lambda n, t: (0, 0)),          # w1t
            pl.BlockSpec((1, Cr), lambda n, t: (0, 0)),          # b1
            pl.BlockSpec((C, Cr), lambda n, t: (0, 0)),          # w2
            pl.BlockSpec((C, 1), lambda n, t: (0, 0)),           # b2
        ],
        out_specs=pl.BlockSpec((1, C, 1), lambda n, t: (n, 0, 0)),
        scratch_shapes=[pltpu.VMEM((C, 1), jnp.float32)],
        compiler_params=pltpu.CompilerParams(
            dimension_semantics=("parallel", "arbitrary"),
            vmem_limit_bytes=_VMEM_LIMIT_BYTES),
    )(x3, w1t, b1r, w2, b2c)

    out = pl.pallas_call(
        _sse_rescale_kernel,
        out_shape=jax.ShapeDtypeStruct((N, C, HW), dtype),
        grid=(N, nt),
        in_specs=[
            pl.BlockSpec((1, C, T), lambda n, t: (n, 0, t)),     # x tile
            pl.BlockSpec((1, C, 1), lambda n, t: (n, 0, 0)),     # cse gates
            pl.BlockSpec((C, 1), lambda n, t: (0, 0)),           # ws
            smem_spec,                                           # bs (SMEM scalar)
        ],
        out_specs=pl.BlockSpec((1, C, T), lambda n, t: (n, 0, t)),
        compiler_params=pltpu.CompilerParams(
            dimension_semantics=("parallel", "parallel"),
            vmem_limit_bytes=_VMEM_LIMIT_BYTES),
    )(x3, cse, wsc, bs)
    return out.reshape(N, C, H, W)


def attention_forward_pallas(x, name=None, params=None, **kwargs):
    """Mirrors Attention(name, **params).forward(x)."""
    if name is None:
        return x                       # nn.Identity
    if name == "scse":
        return scse_forward_pallas(x, params, **kwargs)
    raise ValueError("Attention {} is not implemented".format(name))


# ---------------------------------------------------------------------------
# Parameter init + pure-JAX reference (for validation)
# ---------------------------------------------------------------------------
def init_scse_params(key, in_channels, reduction=16):
    cr = max(1, in_channels // reduction)
    k1, k2, k3, k4, k5, k6 = jax.random.split(key, 6)
    s1 = 1.0 / (in_channels ** 0.5)
    s2 = 1.0 / (cr ** 0.5)
    return {
        "w1": jax.random.uniform(k1, (cr, in_channels), jnp.float32, -s1, s1),
        "b1": jax.random.uniform(k2, (cr,), jnp.float32, -s1, s1),
        "w2": jax.random.uniform(k3, (in_channels, cr), jnp.float32, -s2, s2),
        "b2": jax.random.uniform(k4, (in_channels,), jnp.float32, -s2, s2),
        "ws": jax.random.uniform(k5, (in_channels,), jnp.float32, -s1, s1),
        "bs": jax.random.uniform(k6, (), jnp.float32, -s1, s1),
    }


def scse_reference(x, params):
    w1, b1 = params["w1"], params["b1"]
    w2, b2 = params["w2"], params["b2"]
    ws, bs = params["ws"], params["bs"]
    pooled = jnp.mean(x, axis=(2, 3))                       # (N, C)
    z1 = jnp.maximum(pooled @ w1.T + b1, 0.0)               # (N, Cr)
    z2 = _sigmoid(z1 @ w2.T + b2)                           # (N, C)
    cse = z2[:, :, None, None]
    s = jnp.einsum("nchw,c->nhw", x, ws) + bs
    sse = _sigmoid(s)[:, None, :, :]
    return x * cse + x * sse


if __name__ == "__main__":
    key = jax.random.PRNGKey(0)
    kx, kp = jax.random.split(key)

    # Small shapes consistent with the module (reduction=16 needs C >= 16).
    N, C, H, W = 2, 32, 16, 16
    x = jax.random.normal(kx, (N, C, H, W), dtype=jnp.float32)
    params = init_scse_params(kp, C, reduction=16)
    ref = scse_reference(x, params)

    # 1) Fused whole-slab path (f32).
    out = attention_forward_pallas(x, name="scse", params=params)
    out = jax.block_until_ready(out)
    assert out.shape == x.shape
    assert jnp.allclose(out, ref, rtol=1e-5, atol=1e-5), float(
        jnp.max(jnp.abs(out - ref)))

    # 2) Tiled two-pass fallback (forced, tile=128 -> 2 spatial tiles).
    out_t = attention_forward_pallas(x, name="scse", params=params,
                                     force_tiled=True, tile=128)
    out_t = jax.block_until_ready(out_t)
    assert jnp.allclose(out_t, ref, rtol=1e-5, atol=1e-5), float(
        jnp.max(jnp.abs(out_t - ref)))

    # 3) bf16 streaming path (f32 accumulation, bf16 rescale).
    x_bf = x.astype(jnp.bfloat16)
    out_bf = attention_forward_pallas(x_bf, name="scse", params=params)
    out_bf = jax.block_until_ready(out_bf)
    ref_bf = scse_reference(x_bf.astype(jnp.float32), params)
    assert out_bf.dtype == jnp.bfloat16
    assert jnp.allclose(out_bf.astype(jnp.float32), ref_bf,
                        rtol=5e-2, atol=5e-2), float(
        jnp.max(jnp.abs(out_bf.astype(jnp.float32) - ref_bf)))

    # 4) Identity path (Attention(name=None)).
    out_id = attention_forward_pallas(x, name=None)
    assert jnp.allclose(out_id, x)

    print("KERNEL_OK")
</pallas_src>

<mosaic_0001>
module attributes {stable_mosaic.version = 11 : i64} {
  func.func @_scse_fused_kernel(%arg0: i32, %arg1: memref<1x32x256xf32, #tpu.memory_space<vmem>>, %arg2: memref<32x2xf32, #tpu.memory_space<vmem>>, %arg3: memref<1x2xf32, #tpu.memory_space<vmem>>, %arg4: memref<32x2xf32, #tpu.memory_space<vmem>>, %arg5: memref<32x1xf32, #tpu.memory_space<vmem>>, %arg6: memref<32x1xf32, #tpu.memory_space<vmem>>, %arg7: memref<1xf32, #tpu.memory_space<smem>>, %arg8: memref<1x32x256xf32, #tpu.memory_space<vmem>>) attributes {dimension_semantics = [#tpu.dimension_semantics<parallel>], iteration_bounds = array<i64: 2>, scalar_prefetch = 0 : i64, scratch_operands = 0 : i64, tpu.core_type = #tpu.core_type<tc>, window_params = [{transform_indices = @transform_0, window_bounds = array<i64: 1, 32, 256>}, {pipeline_mode = #tpu.pipeline_mode<synchronous>, transform_indices = @transform_1, window_bounds = array<i64: 32, 2>}, {pipeline_mode = #tpu.pipeline_mode<synchronous>, transform_indices = @transform_2, window_bounds = array<i64: 1, 2>}, {pipeline_mode = #tpu.pipeline_mode<synchronous>, transform_indices = @transform_3, window_bounds = array<i64: 32, 2>}, {pipeline_mode = #tpu.pipeline_mode<synchronous>, transform_indices = @transform_4, window_bounds = array<i64: 32, 1>}, {pipeline_mode = #tpu.pipeline_mode<synchronous>, transform_indices = @transform_5, window_bounds = array<i64: 32, 1>}, {transform_indices = @transform_6, window_bounds = array<i64: 1>}, {transform_indices = @transform_7, window_bounds = array<i64: 1, 32, 256>}]} {
    %c0 = arith.constant 0 : index
    %c0_0 = arith.constant 0 : index
    %c0_1 = arith.constant 0 : index
    %0 = vector.load %arg1[%c0, %c0_0, %c0_1] : memref<1x32x256xf32, #tpu.memory_space<vmem>>, vector<1x32x256xf32>
    %1 = vector.shape_cast %0 : vector<1x32x256xf32> to vector<32x256xf32>
    %cst = arith.constant dense<0.000000e+00> : vector<32xf32>
    %2 = vector.multi_reduction <add>, %1, %cst [1] : vector<32x256xf32> to vector<32xf32>
    %3 = vector.shape_cast %2 : vector<32xf32> to vector<32x1xf32>
    %cst_2 = arith.constant 3.906250e-03 : f32
    %4 = vector.broadcast %cst_2 : f32 to vector<32x1xf32>
    %5 = arith.mulf %3, %4 : vector<32x1xf32>
    %c0_3 = arith.constant 0 : index
    %c0_4 = arith.constant 0 : index
    %6 = vector.load %arg2[%c0_3, %c0_4] : memref<32x2xf32, #tpu.memory_space<vmem>>, vector<32x2xf32>
    %7 = vector.broadcast %5 : vector<32x1xf32> to vector<32x2xf32>
    %8 = arith.mulf %7, %6 : vector<32x2xf32>
    %cst_5 = arith.constant dense<0.000000e+00> : vector<2xf32>
    %9 = vector.multi_reduction <add>, %8, %cst_5 [0] : vector<32x2xf32> to vector<2xf32>
    %10 = vector.shape_cast %9 : vector<2xf32> to vector<1x2xf32>
    %c0_6 = arith.constant 0 : index
    %c0_7 = arith.constant 0 : index
    %11 = vector.load %arg3[%c0_6, %c0_7] : memref<1x2xf32, #tpu.memory_space<vmem>>, vector<1x2xf32>
    %12 = arith.addf %10, %11 : vector<1x2xf32>
    %cst_8 = arith.constant 0.000000e+00 : f32
    %13 = vector.broadcast %cst_8 : f32 to vector<1x2xf32>
    %14 = arith.maximumf %12, %13 : vector<1x2xf32>
    %c0_9 = arith.constant 0 : index
    %c0_10 = arith.constant 0 : index
    %15 = vector.load %arg4[%c0_9, %c0_10] : memref<32x2xf32, #tpu.memory_space<vmem>>, vector<32x2xf32>
    %16 = vector.broadcast %14 : vector<1x2xf32> to vector<32x2xf32>
    %17 = arith.mulf %15, %16 : vector<32x2xf32>
    %cst_11 = arith.constant dense<0.000000e+00> : vector<32xf32>
    %18 = vector.multi_reduction <add>, %17, %cst_11 [1] : vector<32x2xf32> to vector<32xf32>
    %19 = vector.shape_cast %18 : vector<32xf32> to vector<32x1xf32>
    %c0_12 = arith.constant 0 : index
    %c0_13 = arith.constant 0 : index
    %20 = vector.load %arg5[%c0_12, %c0_13] : memref<32x1xf32, #tpu.memory_space<vmem>>, vector<32x1xf32>
    %21 = arith.addf %19, %20 : vector<32x1xf32>
    %cst_14 = arith.constant 0.000000e+00 : f32
    %22 = vector.broadcast %cst_14 : f32 to vector<32x1xf32>
    %23 = arith.subf %22, %21 : vector<32x1xf32>
    %24 = math.exp %23 : vector<32x1xf32>
    %cst_15 = arith.constant 1.000000e+00 : f32
    %25 = vector.broadcast %cst_15 : f32 to vector<32x1xf32>
    %26 = arith.addf %25, %24 : vector<32x1xf32>
    %cst_16 = arith.constant 1.000000e+00 : f32
    %27 = vector.broadcast %cst_16 : f32 to vector<32x1xf32>
    %28 = arith.divf %27, %26 : vector<32x1xf32>
    %c0_17 = arith.constant 0 : index
    %c0_18 = arith.constant 0 : index
    %29 = vector.load %arg6[%c0_17, %c0_18] : memref<32x1xf32, #tpu.memory_space<vmem>>, vector<32x1xf32>
    %30 = vector.broadcast %29 : vector<32x1xf32> to vector<32x256xf32>
    %31 = arith.mulf %1, %30 : vector<32x256xf32>
    %cst_19 = arith.constant dense<0.000000e+00> : vector<256xf32>
    %32 = vector.multi_reduction <add>, %31, %cst_19 [0] : vector<32x256xf32> to vector<256xf32>
    %33 = vector.shape_cast %32 : vector<256xf32> to vector<1x256xf32>
    %c0_20 = arith.constant 0 : index
    %34 = memref.load %arg7[%c0_20] : memref<1xf32, #tpu.memory_space<smem>>
    %35 = vector.broadcast %34 : f32 to vector<1x256xf32>
    %36 = arith.addf %33, %35 : vector<1x256xf32>
    %cst_21 = arith.constant 0.000000e+00 : f32
    %37 = vector.broadcast %cst_21 : f32 to vector<1x256xf32>
    %38 = arith.subf %37, %36 : vector<1x256xf32>
    %39 = math.exp %38 : vector<1x256xf32>
    %cst_22 = arith.constant 1.000000e+00 : f32
    %40 = vector.broadcast %cst_22 : f32 to vector<1x256xf32>
    %41 = arith.addf %40, %39 : vector<1x256xf32>
    %cst_23 = arith.constant 1.000000e+00 : f32
    %42 = vector.broadcast %cst_23 : f32 to vector<1x256xf32>
    %43 = arith.divf %42, %41 : vector<1x256xf32>
    %44 = vector.broadcast %28 : vector<32x1xf32> to vector<32x256xf32>
    %45 = vector.broadcast %43 : vector<1x256xf32> to vector<32x256xf32>
    %46 = arith.addf %44, %45 : vector<32x256xf32>
    %47 = arith.mulf %1, %46 : vector<32x256xf32>
    %c0_24 = arith.constant 0 : index
    %c0_25 = arith.constant 0 : index
    %c0_26 = arith.constant 0 : index
    %48 = vector.load %arg8[%c0_24, %c0_25, %c0_26] : memref<1x32x256xf32, #tpu.memory_space<vmem>>, vector<1x32x256xf32>
    %49 = vector.shape_cast %48 : vector<1x32x256xf32> to vector<32x256xf32>
    %50 = vector.shape_cast %47 : vector<32x256xf32> to vector<1x32x256xf32>
    tpu.vector_store %arg8[%c0_24, %c0_25, %c0_26], %50 {strides = array<i32>} : memref<1x32x256xf32, #tpu.memory_space<vmem>>, vector<1x32x256xf32>,
    return
  }
  func.func @transform_0(%arg0: i32) -> (i32, i32, i32) {
    %c0_i32 = arith.constant 0 : i32
    %c0_i32_0 = arith.constant 0 : i32
    %c0_i32_1 = arith.constant 0 : i32
    return %arg0, %c0_i32, %c0_i32_0 : i32, i32, i32
  }
  func.func @transform_1(%arg0: i32) -> (i32, i32) {
    %c0_i32 = arith.constant 0 : i32
    %c0_i32_0 = arith.constant 0 : i32
    %c0_i32_1 = arith.constant 0 : i32
    return %c0_i32, %c0_i32_0 : i32, i32
  }
  func.func @transform_2(%arg0: i32) -> (i32, i32) {
    %c0_i32 = arith.constant 0 : i32
    %c0_i32_0 = arith.constant 0 : i32
    %c0_i32_1 = arith.constant 0 : i32
    return %c0_i32, %c0_i32_0 : i32, i32
  }
  func.func @transform_3(%arg0: i32) -> (i32, i32) {
    %c0_i32 = arith.constant 0 : i32
    %c0_i32_0 = arith.constant 0 : i32
    %c0_i32_1 = arith.constant 0 : i32
    return %c0_i32, %c0_i32_0 : i32, i32
  }
  func.func @transform_4(%arg0: i32) -> (i32, i32) {
    %c0_i32 = arith.constant 0 : i32
    %c0_i32_0 = arith.constant 0 : i32
    %c0_i32_1 = arith.constant 0 : i32
    return %c0_i32, %c0_i32_0 : i32, i32
  }
  func.func @transform_5(%arg0: i32) -> (i32, i32) {
    %c0_i32 = arith.constant 0 : i32
    %c0_i32_0 = arith.constant 0 : i32
    %c0_i32_1 = arith.constant 0 : i32
    return %c0_i32, %c0_i32_0 : i32, i32
  }
  func.func @transform_6(%arg0: i32) -> i32 {
    %c0_i32 = arith.constant 0 : i32
    %c0_i32_0 = arith.constant 0 : i32
    return %c0_i32 : i32
  }
  func.func @transform_7(%arg0: i32) -> (i32, i32, i32) {
    %c0_i32 = arith.constant 0 : i32
    %c0_i32_0 = arith.constant 0 : i32
    %c0_i32_1 = arith.constant 0 : i32
    return %arg0, %c0_i32, %c0_i32_0 : i32, i32, i32
  }
}

</mosaic_0001>

<bundles_post_ra>
// kernel: tpu_custom_call.1
= control target key start
LH: loop header
LB: loop body
LE: loop exit
PB: predicated region body
PF: predicated region fallthrough
CT: control target
= control target key end

     0   :  { %s968_s0 = inlined_call_operand.vmem [shape: f32[2,32,256], index: 0, kind: input, shape index: {}]   ;;  %s969_s1 = inlined_call_operand.vmem [shape: f32[32,2], index: 1, kind: input, shape index: {}]   ;;  %s970_s2 = inlined_call_operand.vmem [shape: f32[1,2], index: 2, kind: input, shape index: {}]   ;;  %s971_s3 = inlined_call_operand.vmem [shape: f32[32,2], index: 3, kind: input, shape index: {}]   ;;  %s972_s4 = inlined_call_operand.vmem [shape: f32[32,1], index: 4, kind: input, shape index: {}]   ;;  %s973_s5 = inlined_call_operand.vmem [shape: f32[32,1], index: 5, kind: input, shape index: {}]   ;;  %s974_s6 = inlined_call_operand.<no memory space> [shape: f32[1], index: 6, kind: input, shape index: {}]   ;;  %s975_s7 = inlined_call_operand.hbm [shape: f32[2,32,256], index: 7, kind: output, shape index: {}]  }
   0x1   :  { %12 = sst [smem:[#allocation2]] %s974_s6 }
   0x2   :  { %13 = vsyncpa [#allocation4], 0 }
   0x3   :  { %15 = vsyncpa [#allocation4 + $0x1], 0  ;;  %s762_s26 = smov 0   ;;  %s764_s27 = smov 0  }
   0x4   :  { %s766_s28 = smov 0   ;;  %s768_s29 = smov 0  }
   0x5 LB: > { %s783_s6 = sadd.s32 4294967295, %s713_s29   ;;  %s569_s30 = sadd.s32 4294967294, %s713_s29   ;;  %s713_s29 = sphi %s768_s29, %s981_s29   ;;  %s709_s28 = sphi %s766_s28, %s980_s28   ;;  %s705_s27 = sphi %s764_s27, %s979_s27   ;;  %s701_s26 = sphi %s762_s26, %s978_s26  }
   0x6   : > { %s787_s8 = sadd.s32 1, %s713_s29   ;;  %s180_s9 = sadd.s32 1, %s709_s28 }
   0x7   : > { %s177_s10 = ssub.s32 %s713_s29, %s787_s8  ;;  %p190_p0 = scmp.ne.s32.totalorder %s709_s28, %s705_s27 }
   0x8   : > { %p178_p1 = scmp.eq.s32.totalorder %s177_s10, 0  ;;  %p191_p2 = scmp.eq.s32.totalorder %s783_s6, 1 }
   0x9   : > { %p196_p3 = scmp.ne.s32.totalorder %s705_s27, %s701_s26  ;;  %p197_p4 = scmp.eq.s32.totalorder %s569_s30, 1 }
   0xa   : > { %s798_s11 = scalar_select %p178_p1, %s709_s28, %s180_s9  }
   0xb   : > { %p800_p5 = por %p191_p2, %p190_p0  ;;  %p804_p6 = por %p197_p4, %p196_p3 }
   0xc   : > { %p572_p7 = scmp.ge.s32.totalorder %s713_s29, 1  ;;  %p241_p8 = scmp.lt.s32.totalorder %s713_s29, 3 }
   0xe   : > { %p242_p9 = pnand %p572_p7, %p241_p8 }
   0xf   : > { %p273_p10 = scmp.lt.s32.totalorder (!%p242_p9), %s783_s6, 1  ;;  %v715_v12 = vmov (!%p242_p9), 0   ;;  %v302_v16 = vld [vmem:[%s969_s1] sm:$0xff] (!%p242_p9)  ;;  %v304_v18 = vld [vmem:[%s969_s1 + $0x10] sm:$0xff] (!%p242_p9)  ;;  %v303_v19 = vld [vmem:[%s969_s1 + $0x8] sm:$0xff] (!%p242_p9)  ;;  %vm310_vm0 = vcmask (!%p242_p9), 15360   ;;  %v331_v39 = vlaneseq (!%p242_p9) }
  0x10   : > { %245 = sbr.rel (%p242_p9) target bundleno = 540 (0x21c), region = 48  ;;  %626 = vset.pattern.permute.xlu1 (!%p242_p9), %v715_v12  ;;  %625 = vset.pattern.permute.xlu0 (!%p242_p9), %v715_v12  ;;  %v305_v23 = vld [vmem:[%s969_s1 + $0x18] sm:$0xff] (!%p242_p9)  ;;  %v324_v43 = vld [vmem:[%s970_s2] sm:$0x1] (!%p242_p9)  ;;  %v328_v48 = vld [vmem:[%s971_s3 + $0x8] sm:$0xff] (!%p242_p9)  ;;  %s433_s23 = sld [smem:[#allocation2]] (!%p242_p9) }
  0x11   : > { %v332_v42 = vshrl.u32 (!%p242_p9), %v331_v39, 7  ;;  %v327_v49 = vld [vmem:[%s971_s3] sm:$0xff] (!%p242_p9)  ;;  %v330_v51 = vld [vmem:[%s971_s3 + $0x18] sm:$0xff] (!%p242_p9)  ;;  %v329_v52 = vld [vmem:[%s971_s3 + $0x10] sm:$0xff] (!%p242_p9)  ;;  %s270_s24 = sand.u32 (!%p242_p9), 1, %s705_s27   ;;  %s582_s9 = sshll.u32 (!%p242_p9), %s783_s6, 10 }
  0x12   : > { %v384_v61 = vld [vmem:[%s973_s5 + $0x8] sm:$0xff] (!%p242_p9)  ;;  %v385_v62 = vld [vmem:[%s973_s5 + $0x10] sm:$0xff] (!%p242_p9)  ;;  %v383_v63 = vld [vmem:[%s973_s5] sm:$0xff] (!%p242_p9)  ;;  %s573_s25 = sshll.u32 (!%p242_p9), %s270_s24, 6  ;;  %s919_s16 = scalar_lea.hbm (!%p242_p9), %s975_s7, %s582_s9 }
  0x13   : > { %v333_v46 = vsub.s32 (!%p242_p9), 0, %v332_v42  ;;  %s272_s30 = scalar_lea.vmem (!%p242_p9), [#allocation3], %s573_s25 }
  0x14   : > { %s507_s10 = sshll.u32 (!%p242_p9), %s272_s30, 4  ;;  %s921_s10 = int_to_ptr.vmem [resolvable:$true] %s507_s10 }
  0x15   : > { %s651_s17 = scalar_lea.vmem (!%p242_p9), %s921_s10, 1024 }
  0x16   : > { %p652_p11 = scmp.ne.s32.totalorder (!%p242_p9), %s921_s10, %s651_s17 }
  0x17   : > { %s274_s14 = scalar_select %p273_p10, %s783_s6, 1 }
  0x18   : > { %s927_s6 = scalar_lea.sflag [#allocation4], %s270_s24  ;;  %p653_p12 = pnand %p652_p11, %p800_p5 }
  0x19   : > { %s581_s15 = sshll.u32 %s274_s14, 6 }
  0x1a   : > { %s277_s18 = scalar_lea.vmem %s968_s0, %s581_s15  ;;  %p654_p13 = pneg %p653_p12 }
  0x1b   : > { %v815_v0 = vld [vmem:[%s277_s18] sm:$0xff]  ;;  %v817_v1 = vld [vmem:[%s277_s18 + $0x8] sm:$0xff]  ;;  %v825_v5 = vld [vmem:[%s277_s18 + $0x10] sm:$0xff] }
  0x1c   : > { %v819_v2 = vld [vmem:[%s277_s18 + $0x20] sm:$0xff]  ;;  %v286_v3 = vadd.f32 %v817_v1, %v815_v0  ;;  %v823_v4 = vld [vmem:[%s277_s18 + $0x28] sm:$0xff]  ;;  %v827_v6 = vld [vmem:[%s277_s18 + $0x18] sm:$0xff] }
  0x1d   : > { %v292_v7 = vadd.f32 %v823_v4, %v819_v2  ;;  %v831_v8 = vld [vmem:[%s277_s18 + $0x30] sm:$0xff]  ;;  %v833_v9 = vld [vmem:[%s277_s18 + $0x38] sm:$0xff]  ;;  %v289_v10 = vadd.f32 %v827_v6, %v825_v5  ;;  %s716_s18 = smov [#allocation3]  }
  0x1e   : > { %287 = vadd.xlane.f32.xlu0 %v286_v3  ;;  %v295_v11 = vadd.f32 %v833_v9, %v831_v8  ;;  %v386_v3 = vld [vmem:[%s973_s5 + $0x18] sm:$0xff]  ;;  %s655_s19 = sshll.u32 %s716_s18, 4  ;;  %s656_s19 = int_to_ptr.vmem [resolvable:$false] %s655_s19 }
  0x1f   : > { %293 = vadd.xlane.f32.xlu1 %v292_v7  ;;  %v352_v7 = vld [vmem:[%s972_s4 + $0x8] sm:$0xff]  ;;  %s657_s20 = scalar_lea.vmem %s656_s19, 2048  ;;  %p658_p0 = scmp.lt.s32.totalorder %s921_s10, %s656_s19 }
  0x20   : > { %p659_p1 = scmp.lt.s32.totalorder %s657_s20, %s651_s17 }
  0x22   : > { %290 = vadd.xlane.f32.xlu0 %v289_v10  ;;  %v351_v10 = vld [vmem:[%s972_s4] sm:$0xff]  ;;  %p660_p2 = por %p659_p1, %p658_p0 }
  0x23   : > { %296 = vadd.xlane.f32.xlu1 %v295_v11 }
  0x24   : > { %p661_p3 = pnand %p660_p2, %p654_p13 }
  0xab   : > { %v288_v13 = vpop.xlane.xlu0 %287 }
  0xac   : > { %v298_v14 = vmul.f32 0.00390625, %v288_v13  ;;  %v294_v15 = vpop.xlane.xlu1 %293 }
  0xad   : > { %v300_v17 = vmul.f32 0.00390625, %v294_v15  ;;  %v354_v15 = vld [vmem:[%s972_s4 + $0x18] sm:$0xff] }
  0xae   : > { %v306_v21 = vmul.f32 %v302_v16, %v298_v14  ;;  %v353_v16 = vld [vmem:[%s972_s4 + $0x10] sm:$0xff] }
  0xaf   : > { %v291_v20 = vpop.xlane.xlu0 %290  ;;  %v308_v26 = vmul.f32 %v304_v18, %v300_v17 }
  0xb0   : > { %v299_v22 = vmul.f32 0.00390625, %v291_v20  ;;  %v297_v24 = vpop.xlane.xlu1 %296  ;;  %v311_v29 = vsel %vm310_vm0, %v306_v21, 0.0 }
  0xb1   : > { %v301_v25 = vmul.f32 0.00390625, %v297_v24  ;;  %v314_v32 = vsel %vm310_vm0, %v308_v26, 0.0 }
  0xb2   : > { %v307_v27 = vmul.f32 %v303_v19, %v299_v22 }
  0xb3   : > { %v309_v28 = vmul.f32 %v305_v23, %v301_v25 }
  0xb4   : > { %v312_v30 = vsel %vm310_vm0, %v307_v27, 0.0 }
  0xb5   : > { %v313_v31 = vadd.f32 %v312_v30, %v311_v29  ;;  %v316_v33 = vsel %vm310_vm0, %v309_v28, 0.0 }
  0xb7   : > { %v315_v34 = vadd.f32 %v314_v32, %v313_v31 }
  0xb9   : > { %v317_v35 = vadd.f32 %v316_v33, %v315_v34 }
  0xbb   : > { %v318_v36 = vrot.slane %v317_v35, 4 }
  0xbd   : > { %v319_v37 = vadd.f32 %v318_v36, %v317_v35 }
  0xbf   : > { %v320_v38 = vrot.slane %v319_v37, 2 }
  0xc1   : > { %v321_v40 = vadd.f32 %v320_v38, %v319_v37 }
  0xc3   : > { %v322_v41 = vrot.slane %v321_v40, 1 }
  0xc5   : > { %v323_v44 = vadd.f32 %v322_v41, %v321_v40 }
  0xc7   : > { %v325_v45 = vadd.f32 %v324_v43, %v323_v44 }
  0xc9   : > { %v326_v47 = vmax.f32 %v325_v45, 0.0 }
  0xcb   : > { %v334_v50 = vrot.slane %v326_v47, %v333_v46 }
  0xcd   : > { %v336_v53 = vmul.f32 %v334_v50, %v328_v48  ;;  %v335_v54 = vmul.f32 %v334_v50, %v327_v49  ;;  %v338_v57 = vmul.f32 %v334_v50, %v330_v51  ;;  %v337_v58 = vmul.f32 %v334_v50, %v329_v52 }
  0xcf   : > { %v342_v55 = vsel %vm310_vm0, %v336_v53, 0.0  ;;  %v339_v56 = vsel %vm310_vm0, %v335_v54, 0.0  ;;  %v348_v59 = vsel %vm310_vm0, %v338_v57, 0.0  ;;  %v345_v60 = vsel %vm310_vm0, %v337_v58, 0.0 }
  0xd0   : > { %343 = vadd.xlane.f32.xlu1 %v342_v55  ;;  %340 = vadd.xlane.f32.xlu0 %v339_v56 }
  0xd4   : > { %349 = vadd.xlane.f32.xlu1 %v348_v59  ;;  %346 = vadd.xlane.f32.xlu0 %v345_v60 }
  0xe5   : > { %394 = vperm.xlu1 %626, %v384_v61  }
  0xe9   : > { %399 = vperm.xlu1 %626, %v385_v62  }
  0xea   : > { %389 = vperm.xlu0 %625, %v383_v63  }
  0xed   : > { %404 = vperm.xlu1 %626, %v386_v3  }
 0x15d   : > { %v344_v11 = vpop.xlane.xlu1 %343  ;;  %v341_v12 = vpop.xlane.xlu0 %340 }
 0x15e   : > { %v356_v13 = vadd.f32 %v352_v7, %v344_v11  ;;  %v355_v14 = vadd.f32 %v351_v10, %v341_v12 }
 0x160   : > { %v360_v17 = vsub.f32 0.0, %v356_v13  ;;  %v359_v18 = vsub.f32 0.0, %v355_v14  ;;  %v434_v14 = vstv %s433_s23 }
 0x161   : > { %v350_v19 = vpop.xlane.xlu1 %349  ;;  %v347_v20 = vpop.xlane.xlu0 %346 }
 0x162   : > { %v365_v21 = vmul.f32 1.442695, %v360_v17  ;;  %v363_v22 = vmul.f32 1.442695, %v359_v18  ;;  %v358_v23 = vadd.f32 %v354_v15, %v350_v19  ;;  %v357_v24 = vadd.f32 %v353_v16, %v347_v20 }
 0x164   : > { %627 = vpow2.f32 %v365_v21  ;;  %v361_v25 = vsub.f32 0.0, %v357_v24  ;;  %v362_v26 = vsub.f32 0.0, %v358_v23 }
 0x165   : > { %629 = vpow2.f32 %v363_v22  ;;  %v395_v41 = vpop.permute.xlu1 %394 }
 0x166   : > { %v367_v27 = vmul.f32 1.442695, %v361_v25  ;;  %v369_v28 = vmul.f32 1.442695, %v362_v26  ;;  %v409_v44 = vmul.f32 %v395_v41, %v825_v5  ;;  %v410_v46 = vmul.f32 %v395_v41, %v827_v6 }
 0x168   : > { %631 = vpow2.f32 %v367_v27 }
 0x169   : > { %633 = vpow2.f32 %v369_v28  ;;  %v390_v42 = vpop.permute.xlu0 %389  ;;  %v400_v43 = vpop.permute.xlu1 %399 }
 0x16a   : > { %v407_v45 = vmul.f32 %v390_v42, %v815_v0  ;;  %v408_v47 = vmul.f32 %v390_v42, %v817_v1  ;;  %v411_v48 = vmul.f32 %v400_v43, %v819_v2  ;;  %v412_v50 = vmul.f32 %v400_v43, %v823_v4 }
 0x16c   : > { %v415_v49 = vadd.f32 %v409_v44, %v407_v45  ;;  %v424_v51 = vadd.f32 %v410_v46, %v408_v47 }
 0x16d   : > { %v405_v52 = vpop.permute.xlu1 %404 }
 0x16e   : > { %v628_v29 = vpop.eup %627  ;;  %v416_v53 = vadd.f32 %v415_v49, %v411_v48  ;;  %v413_v54 = vmul.f32 %v405_v52, %v831_v8  ;;  %v425_v55 = vadd.f32 %v424_v51, %v412_v50  ;;  %v414_v56 = vmul.f32 %v405_v52, %v833_v9 }
 0x16f   : > { %v630_v30 = vpop.eup %629  ;;  %v372_v32 = vadd.f32 1.0, %v628_v29 }
 0x170   : > { %v371_v31 = vadd.f32 1.0, %v630_v30  ;;  %v417_v57 = vadd.f32 %v416_v53, %v413_v54  ;;  %v426_v58 = vadd.f32 %v425_v55, %v414_v56 }
 0x172   : > { %635 = vrcp.f32 %v371_v31  ;;  %v632_v33 = vpop.eup %631  ;;  %v418_v59 = vrot.slane %v417_v57, 4  ;;  %v427_v60 = vrot.slane %v426_v58, 4 }
 0x173   : > { %637 = vrcp.f32 %v372_v32  ;;  %v373_v34 = vadd.f32 1.0, %v632_v33  ;;  %v634_v35 = vpop.eup %633 }
 0x174   : > { %v374_v36 = vadd.f32 1.0, %v634_v35  ;;  %v419_v61 = vadd.f32 %v418_v59, %v417_v57  ;;  %v428_v62 = vadd.f32 %v427_v60, %v426_v58 }
 0x175   : > { %639 = vrcp.f32 %v373_v34 }
 0x176   : > { %641 = vrcp.f32 %v374_v36  ;;  %v420_v63 = vrot.slane %v419_v61, 2  ;;  %v429_v3 = vrot.slane %v428_v62, 2 }
 0x178   : > { %v421_v7 = vadd.f32 %v420_v63, %v419_v61  ;;  %v430_v10 = vadd.f32 %v429_v3, %v428_v62 }
 0x17a   : > { %v422_v11 = vrot.slane %v421_v7, 1  ;;  %v431_v12 = vrot.slane %v430_v10, 1 }
 0x17c   : > { %v636_v37 = vpop.eup %635  ;;  %v423_v13 = vadd.f32 %v422_v11, %v421_v7  ;;  %v432_v15 = vadd.f32 %v431_v12, %v430_v10 }
 0x17d   : > { %451 = vperm.xlu1 %626, %v636_v37   ;;  %v638_v38 = vpop.eup %637 }
 0x17e   : > { %v435_v16 = vadd.f32 %v434_v14, %v423_v13  ;;  %v436_v17 = vadd.f32 %v434_v14, %v432_v15 }
 0x17f   : > { %v640_v39 = vpop.eup %639 }
 0x180   : > { %v642_v40 = vpop.eup %641  ;;  %v437_v18 = vsub.f32 0.0, %v435_v16  ;;  %v438_v19 = vsub.f32 0.0, %v436_v17 }
 0x181   : > { %456 = vperm.xlu1 %626, %v638_v38  }
 0x182   : > { %v439_v20 = vmul.f32 1.442695, %v437_v18  ;;  %v441_v21 = vmul.f32 1.442695, %v438_v19 }
 0x184   : > { %643 = vpow2.f32 %v439_v20 }
 0x185   : > { %461 = vperm.xlu1 %626, %v640_v39   ;;  %645 = vpow2.f32 %v441_v21 }
 0x189   : > { %466 = vperm.xlu1 %626, %v642_v40  }
 0x18e   : > { %v644_v22 = vpop.eup %643 }
 0x18f   : > { %v646_v23 = vpop.eup %645  ;;  %v443_v24 = vadd.f32 1.0, %v644_v22 }
 0x190   : > { %v444_v25 = vadd.f32 1.0, %v646_v23 }
 0x191   : > { %647 = vrcp.f32 %v443_v24 }
 0x192   : > { %649 = vrcp.f32 %v444_v25 }
 0x19b   : > { %v648_v26 = vpop.eup %647 }
 0x19c   : > { %v650_v27 = vpop.eup %649 }
 0x1fc   : > { %v452_v28 = vpop.permute.xlu1 %451 }
 0x1fd   : > { %v469_v29 = vadd.f32 %v648_v26, %v452_v28  ;;  %v470_v30 = vadd.f32 %v650_v27, %v452_v28 }
 0x1ff   : > { %v477_v31 = vmul.f32 %v469_v29, %v815_v0  ;;  %v478_v32 = vmul.f32 %v470_v30, %v817_v1 }
 0x200   : > { %v457_v33 = vpop.permute.xlu1 %456 }
 0x201   : > { %485 = vst [vmem:[%s272_s30] sm:$0xff] %v477_v31  ;;  %486 = vst [vmem:[%s272_s30 + $0x8] sm:$0xff] %v478_v32  ;;  %v471_v34 = vadd.f32 %v648_v26, %v457_v33  ;;  %v472_v35 = vadd.f32 %v650_v27, %v457_v33 }
 0x203   : > { %v479_v36 = vmul.f32 %v471_v34, %v825_v5  ;;  %v480_v37 = vmul.f32 %v472_v35, %v827_v6 }
 0x204   : > { %v462_v38 = vpop.permute.xlu1 %461 }
 0x205   : > { %487 = vst [vmem:[%s272_s30 + $0x10] sm:$0xff] %v479_v36  ;;  %488 = vst [vmem:[%s272_s30 + $0x18] sm:$0xff] %v480_v37  ;;  %v473_v39 = vadd.f32 %v648_v26, %v462_v38  ;;  %v474_v40 = vadd.f32 %v650_v27, %v462_v38 }
 0x207   : > { %v481_v0 = vmul.f32 %v473_v39, %v819_v2  ;;  %v482_v1 = vmul.f32 %v474_v40, %v823_v4 }
 0x208   : > { %v467_v41 = vpop.permute.xlu1 %466 }
 0x209   : > { %489 = vst [vmem:[%s272_s30 + $0x20] sm:$0xff] %v481_v0  ;;  %490 = vst [vmem:[%s272_s30 + $0x28] sm:$0xff] %v482_v1  ;;  %v475_v42 = vadd.f32 %v648_v26, %v467_v41  ;;  %v476_v5 = vadd.f32 %v650_v27, %v467_v41 }
 0x20b   : > { %v483_v2 = vmul.f32 %v475_v42, %v831_v8  ;;  %v484_v4 = vmul.f32 %v476_v5, %v833_v9 }
 0x20d   : > { %491 = vst [vmem:[%s272_s30 + $0x30] sm:$0xff] %v483_v2  ;;  %492 = vst [vmem:[%s272_s30 + $0x38] sm:$0xff] %v484_v4 }
 0x20e   : > { %664 = shalt.err (!%p661_p3)
}
 0x20f   : > { %s665_s21 = scalar_lea.hbm %s919_s16, 1024  ;;  %s669_s24 = scalar_lea.hbm %s975_s7, 2048 }
 0x210   : > { %p666_p4 = scmp.ne.s32.totalorder %s919_s16, %s665_s21  ;;  %p670_p9 = scmp.lt.u32.totalorder %s919_s16, %s975_s7 }
 0x211   : > { %p671_p10 = scmp.lt.u32.totalorder %s669_s24, %s665_s21  ;;  %p673_p12 = scmp.lt.u32.totalorder %s665_s21, %s919_s16 }
 0x212   : > { %p667_p7 = pnand %p666_p4, %p800_p5 }
 0x213   : > { %p672_p11 = por %p671_p10, %p670_p9 }
 0x214   : > { %p668_p8 = pneg %p667_p7 }
 0x215   : > { %p674_p13 = por %p673_p12, %p672_p11 }
 0x217   : > { %p675_p0 = pnand %p674_p13, %p668_p8 }
 0x219   : > { %678 = shalt.err (!%p675_p0)
}
 0x21a   : > { %s717_s9 = smov 256   ;;  %s718_s14 = smov 16  }
 0x21b   : > { %583 = dma.vmem_to_hbm [thread:$0]  (%p800_p5), %s921_s10, 1024, %s919_s16, %s927_s6, %s717_s9, %s717_s9, %s718_s14  }
 0x21c PF: > { %p589_p1 = scmp.ge.s32.totalorder %s713_s29, 2  ;;  %s522_s15 = sand.u32 1, %s701_s26  }
 0x21d   : > { %s523_s17 = scalar_lea.sflag [#allocation4], %s522_s15 }
 0x21e   : > { %p586_p2 = pnand %p589_p1, %p804_p6 }
 0x220   : > { %696 = dma.done.wait (!%p586_p2), %s523_s17, 1024  }
 0x221   : > { %698 = vsyncadd (!%p586_p2), %s523_s17, 4294966272  ;;  %p18_p3 = scmp.ge.s32.totalorder %s787_s8, 4   ;;  %s978_s26 = smov %s705_s27 }
 0x222   : > { %s979_s27 = smov %s709_s28  ;;  %s980_s28 = smov %s798_s11 }
 0x223   : > { %s981_s29 = smov %s787_s8  ;;  %20 = sbr.rel (!%p18_p3) target bundleno = 5 (0x5), region = 83 }
 0x22a   :  { %528 = vsyncpa [#allocation4], 1 }
 0x22b   :  { %530 = vsyncpa [#allocation4 + $0x1], 1 }

</bundles_post_ra>
